<compile_context>
chip_gen: v6e
topology: v6e:2x2x1
jax: 0.10.0
libtpu: 0.0.40
codegen_flags: <defaults>
</compile_context>

<pallas_src>
import jax
import jax.numpy as jnp
from jax.experimental import pallas as pl
from jax.experimental.pallas import tpu as pltpu

_LANE = 128
_SUBLANE = 8
_TARGET_BLOCK_BYTES = 2 * 1024 * 1024   # ~2 MiB output block (v7x-safe when double-buffered)
_PALLAS_MIN_BYTES = 1 << 20             # below this, plain XLA broadcast is strictly faster


def _constant_kernel(c_ref, o_ref):
    # Pure store path: broadcast the resident (1, W) const row over the tile.
    # No x stream, no vmul/vadd — steady state is write-only DMA + vst.
    o_ref[...] = jnp.broadcast_to(c_ref[...], o_ref.shape)


def _broadcast_rows_pallas(c_row, rows):
    """Broadcast a (1, W) row to a (rows, W) array with a tiled Pallas kernel."""
    _, w = c_row.shape
    itemsize = jnp.dtype(c_row.dtype).itemsize

    if rows <= _SUBLANE:
        tile_rows = rows                       # full-extent block is always legal
    else:
        max_rows = max(_SUBLANE, _TARGET_BLOCK_BYTES // (w * itemsize))
        tile_rows = min(rows, max_rows)
        tile_rows = max(_SUBLANE, (tile_rows // _SUBLANE) * _SUBLANE)  # sublane-aligned
        if tile_rows >= rows:
            tile_rows = rows

    grid = (pl.cdiv(rows, tile_rows),)

    return pl.pallas_call(
        _constant_kernel,
        out_shape=jax.ShapeDtypeStruct((rows, w), c_row.dtype),
        grid_spec=pltpu.PrefetchScalarGridSpec(
            num_scalar_prefetch=0,
            grid=grid,
            in_specs=[
                # const row stays VMEM-resident (same block every grid step).
                pl.BlockSpec((1, w), lambda i: (0, 0)),
            ],
            out_specs=pl.BlockSpec((tile_rows, w), lambda i: (i, 0)),
        ),
        compiler_params=pltpu.CompilerParams(
            dimension_semantics=("parallel",),
        ),
    )(c_row)


def constant_forward(x, const, *, force_pallas=False):
    """Pallas implementation of Constant.forward(x) = x * 0 + const.

    x:     (B, D) array (values unused for finite inputs; shape/dtype only)
    const: (1, D) parameter
    """
    B, D = x.shape
    assert const.shape == (1, D)

    out_dtype = jnp.result_type(x.dtype, const.dtype)
    c = const.astype(out_dtype)

    total_bytes = B * D * jnp.dtype(out_dtype).itemsize
    if not force_pallas and total_bytes < _PALLAS_MIN_BYTES:
        # Tiny output: launch + pipeline prologue of a Pallas call dominates;
        # let XLA broadcast / fuse into the consumer.
        return jnp.broadcast_to(c, (B, D))

    # Lane-dense repack: D < 128 would force masked partial vst on every store.
    # If 128 % D == 0 and B*D is a multiple of 128, emit a (B*D/128, 128) slab
    # whose rows are all equal to const tiled to 128 lanes, then reshape back.
    if D < _LANE and _LANE % D == 0 and (B * D) % _LANE == 0:
        rep = _LANE // D
        c_wide = jnp.tile(c, (1, rep))                      # (1, 128), tiny XLA op
        rows = (B * D) // _LANE
        out = _broadcast_rows_pallas(c_wide, rows)          # (rows, 128), unmasked vst
        return out.reshape(B, D)

    # D already lane-friendly (or not evenly tileable): broadcast directly.
    return _broadcast_rows_pallas(c, B)


if __name__ == "__main__":
    key = jax.random.PRNGKey(0)
    k_x, k_c, k_x2 = jax.random.split(key, 3)

    # Small shapes consistent with nn.Parameter(torch.randn(1, dim)).
    B, DIM = 8, 32
    x = jax.random.normal(k_x, (B, DIM), dtype=jnp.float32)
    const = jax.random.normal(k_c, (1, DIM), dtype=jnp.float32)

    # Force the Pallas path even at tiny size so the kernel itself is exercised.
    out = constant_forward(x, const, force_pallas=True)
    out = jax.block_until_ready(out)
    ref = x * 0 + const
    assert out.shape == (B, DIM) and out.dtype == ref.dtype
    assert jnp.allclose(out, ref), "mismatch vs reference (small)"

    # Larger batch: exercises the lane-dense multi-block (tiled, pipelined) path.
    B2 = 16384
    x2 = jax.random.normal(k_x2, (B2, DIM), dtype=jnp.float32)
    out2 = constant_forward(x2, const)
    out2 = jax.block_until_ready(out2)
    ref2 = x2 * 0 + const
    assert out2.shape == (B2, DIM)
    assert jnp.allclose(out2, ref2), "mismatch vs reference (large)"

    print("KERNEL_OK")
</pallas_src>

<mosaic_0001>
module attributes {stable_mosaic.version = 11 : i64} {
  func.func @_constant_kernel(%arg0: i32, %arg1: memref<1x128xf32, #tpu.memory_space<vmem>>, %arg2: memref<2x128xf32, #tpu.memory_space<vmem>>) attributes {dimension_semantics = [#tpu.dimension_semantics<parallel>], iteration_bounds = array<i64: 1>, scalar_prefetch = 0 : i64, scratch_operands = 0 : i64, tpu.core_type = #tpu.core_type<tc>, window_params = [{pipeline_mode = #tpu.pipeline_mode<synchronous>, transform_indices = @transform_0, window_bounds = array<i64: 1, 128>}, {transform_indices = @transform_1, window_bounds = array<i64: 2, 128>}]} {
    %c0 = arith.constant 0 : index
    %c0_0 = arith.constant 0 : index
    %0 = vector.load %arg1[%c0, %c0_0] : memref<1x128xf32, #tpu.memory_space<vmem>>, vector<1x128xf32>
    %1 = vector.shape_cast %0 : vector<1x128xf32> to vector<1x128xf32>
    %2 = vector.broadcast %1 : vector<1x128xf32> to vector<2x128xf32>
    %c0_1 = arith.constant 0 : index
    %c0_2 = arith.constant 0 : index
    %3 = vector.load %arg2[%c0_1, %c0_2] : memref<2x128xf32, #tpu.memory_space<vmem>>, vector<2x128xf32>
    tpu.vector_store %arg2[%c0_1, %c0_2], %2 {strides = array<i32>} : memref<2x128xf32, #tpu.memory_space<vmem>>, vector<2x128xf32>,
    return
  }
  func.func @transform_0(%arg0: i32) -> (i32, i32) {
    %c0_i32 = arith.constant 0 : i32
    %c0_i32_0 = arith.constant 0 : i32
    %c0_i32_1 = arith.constant 0 : i32
    return %c0_i32, %c0_i32_0 : i32, i32
  }
  func.func @transform_1(%arg0: i32) -> (i32, i32) {
    %c0_i32 = arith.constant 0 : i32
    %c0_i32_0 = arith.constant 0 : i32
    return %arg0, %c0_i32 : i32, i32
  }
}

</mosaic_0001>

<bundles_post_ra>
// kernel: tpu_custom_call.1
= control target key start
LH: loop header
LB: loop body
LE: loop exit
PB: predicated region body
PF: predicated region fallthrough
CT: control target
= control target key end

     0   :  { %6 = vsyncpa [#allocation3], 0  ;;  %s109_s0 = inlined_call_operand.hbm [shape: f32[1,128], index: 0, kind: input, shape index: {}]   ;;  %s110_s1 = inlined_call_operand.hbm [shape: f32[2,128], index: 1, kind: output, shape index: {}]  }
   0x1   :  { %7 = vsyncpa [#allocation4], 0  ;;  %s91_s6 = smov [#allocation2]  }
   0x2   :  { %s14_s7 = sshll.u32 %s91_s6, 4  ;;  %s15_s7 = int_to_ptr.vmem [resolvable:$true] %s14_s7 }
   0x3   :  { %s55_s8 = scalar_lea.vmem %s15_s7, 16  ;;  %s59_s9 = scalar_lea.vmem %s15_s7, 32 }
   0x4   :  { %p56_p0 = scmp.ne.s32.totalorder %s15_s7, %s55_s8  ;;  %p60_p1 = scmp.lt.s32.totalorder %s15_s7, %s15_s7 }
   0x5   :  { %p61_p2 = scmp.lt.s32.totalorder %s59_s9, %s55_s8 }
   0x7   :  { %p62_p3 = por %p61_p2, %p60_p1 }
   0x9   :  { %p63_p4 = pnand %p62_p3, %p56_p0 }
   0xb   :  { %66 = shalt.err (!%p63_p4)
}
   0xc   :  { %17 = dma.hbm_to_vmem [thread:$0]  %s109_s0, 16, %s15_s7, [#allocation3]  }
   0xd   :  { %87 = dma.done.wait [#allocation3], 16  }
   0xe   :  { %88 = vsyncadd [#allocation3], 4294967280  ;;  %s92_s12 = smov [#allocation5]   ;;  %v44_v0 = vld [vmem:[#allocation2] ss:$0 sm:$0xff] }
   0xf   :  { %s35_s13 = sshll.u32 %s92_s12, 4  ;;  %28 = vst [vmem:[#allocation5] sm:$0x3] %v44_v0  ;;  %s36_s13 = int_to_ptr.vmem [resolvable:$true] %s35_s13 }
  0x10   :  { %s67_s14 = scalar_lea.vmem %s36_s13, 32  ;;  %p72_p6 = scmp.lt.s32.totalorder %s36_s13, %s36_s13 }
  0x11   :  { %p68_p5 = scmp.ne.s32.totalorder %s36_s13, %s67_s14  ;;  %p73_p7 = scmp.lt.s32.totalorder %s67_s14, %s67_s14 }
  0x13   :  { %p74_p8 = por %p73_p7, %p72_p6 }
  0x15   :  { %p75_p9 = pnand %p74_p8, %p68_p5 }
  0x17   :  { %78 = shalt.err (!%p75_p9)
}
  0x18   :  { %38 = dma.vmem_to_hbm [thread:$0]  %s36_s13, 32, %s110_s1, [#allocation4]  }
  0x19   :  { %89 = dma.done.wait [#allocation4], 32  }
  0x1a   :  { %90 = vsyncadd [#allocation4], 4294967264 }
  0x1b   :  { %42 = vsyncpa [#allocation3], 1 }
  0x1c   :  { %43 = vsyncpa [#allocation4], 1 }

</bundles_post_ra>
